<compile_context>
chip_gen: v5e
topology: v5e:2x2
jax: 0.10.0
libtpu: 0.0.40
codegen_flags: <defaults>
</compile_context>

<pallas_src>
import functools

import jax
import jax.numpy as jnp
from jax.experimental import pallas as pl
from jax.experimental.pallas import tpu as pltpu


def reduce_kernel(x_ref, w1_ref, b1_ref, w2t_ref, b2_ref, g_ref, beta_ref,
                  ln_ref, acc_ref, *, n_points, eps=1e-5):
    """Pass 1: per-batch mean over points -> conv -> linear -> LayerNorm."""
    nt = pl.program_id(1)

    @pl.when(nt == 0)
    def _():
        acc_ref[...] = jnp.zeros_like(acc_ref)

    # Running per-batch sum of the raw input channels over this point tile.
    acc_ref[...] += jnp.sum(x_ref[0], axis=0, keepdims=True)            # (1, Cin)

    @pl.when(nt == pl.num_programs(1) - 1)
    def _():
        x_mean = acc_ref[...] * (1.0 / n_points)                        # (1, Cin)
        # Affine MPVCNN2 stand-in commutes with the mean: conv(mean(x)).
        f2 = jnp.dot(x_mean, w1_ref[...],
                     preferred_element_type=jnp.float32) + b1_ref[...]  # (1, Cout)
        lin = jnp.dot(f2, w2t_ref[...],
                      preferred_element_type=jnp.float32) + b2_ref[...]  # (1, L)
        mu = jnp.mean(lin, axis=-1, keepdims=True)
        var = jnp.mean((lin - mu) ** 2, axis=-1, keepdims=True)
        ln_ref[0] = (lin - mu) * jax.lax.rsqrt(var + eps) * g_ref[...] + beta_ref[...]


def write_kernel(x_ref, ln_ref, out_ref, *, latent):
    """Pass 2: stream coords + broadcast LN feature row into the output tile."""
    x = x_ref[0]                                                        # (TN, Cin)
    tn = x.shape[0]
    feat = jnp.broadcast_to(ln_ref[0], (tn, latent))                    # (TN, L)
    # Single store of the final-width tile: coords in channels 0..2, the
    # per-batch LayerNorm row broadcast over points in channels 3..3+L-1.
    out_ref[0] = jnp.concatenate([x[:, :3], feat], axis=-1)             # (TN, 3+L)


def _choose_tile(n, max_tile=1024):
    """Largest divisor of n that keeps blocks sublane-friendly and <= max_tile."""
    if n <= max_tile:
        return n
    for d in range(max_tile, 7, -1):
        if n % d == 0 and d % 8 == 0:
            return d
    return n  # fallback: full N (awkward point counts)


def feature_map_ae_forward(ply_bnc, w1, b1, w2t, b2, gamma, beta,
                           *, max_tile=1024):
    """ply_bnc: (B, N, Cin) float32.  Returns (feat_map (B,N,3+L), coords view)."""
    B, N, Cin = ply_bnc.shape
    Cout = w1.shape[1]
    L = w2t.shape[1]
    CO = 3 + L

    TN = _choose_tile(N, max_tile)
    NT = N // TN

    # Conservative scoped-VMEM budget; safe on v5e/v6e (128 MiB) and v7x (64 MiB).
    vmem_limit = 32 * 1024 * 1024

    # ---- pass 1: per-batch reduction + conv + linear + LayerNorm ----
    ln_row = pl.pallas_call(
        functools.partial(reduce_kernel, n_points=N),
        out_shape=jax.ShapeDtypeStruct((B, 1, L), jnp.float32),
        grid_spec=pltpu.PrefetchScalarGridSpec(
            num_scalar_prefetch=0,
            grid=(B, NT),
            in_specs=[
                pl.BlockSpec((1, TN, Cin), lambda b, t: (b, t, 0)),   # ply tile
                pl.BlockSpec((Cin, Cout), lambda b, t: (0, 0)),       # conv weight
                pl.BlockSpec((1, Cout), lambda b, t: (0, 0)),         # conv bias
                pl.BlockSpec((Cout, L), lambda b, t: (0, 0)),         # linear W^T
                pl.BlockSpec((1, L), lambda b, t: (0, 0)),            # linear bias
                pl.BlockSpec((1, L), lambda b, t: (0, 0)),            # LN gamma
                pl.BlockSpec((1, L), lambda b, t: (0, 0)),            # LN beta
            ],
            out_specs=pl.BlockSpec((1, 1, L), lambda b, t: (b, 0, 0)),
            scratch_shapes=[pltpu.VMEM((1, Cin), jnp.float32)],
        ),
        compiler_params=pltpu.CompilerParams(
            dimension_semantics=("parallel", "arbitrary"),
            vmem_limit_bytes=vmem_limit),
    )(ply_bnc, w1, b1, w2t, b2, gamma, beta)

    # ---- pass 2: write coords + broadcast features at final width (3+L) ----
    feat_map = pl.pallas_call(
        functools.partial(write_kernel, latent=L),
        out_shape=jax.ShapeDtypeStruct((B, N, CO), jnp.float32),
        grid_spec=pltpu.PrefetchScalarGridSpec(
            num_scalar_prefetch=0,
            grid=(B, NT),
            in_specs=[
                pl.BlockSpec((1, TN, Cin), lambda b, t: (b, t, 0)),   # ply tile
                pl.BlockSpec((1, 1, L), lambda b, t: (b, 0, 0)),      # LN row
            ],
            out_specs=pl.BlockSpec((1, TN, CO), lambda b, t: (b, t, 0)),
        ),
        compiler_params=pltpu.CompilerParams(
            dimension_semantics=("parallel", "parallel"),
            vmem_limit_bytes=vmem_limit),
    )(ply_bnc, ln_row)

    # coords alias the first 3 output channels (no separate slice of ply).
    coords = feat_map[:, :, :3]
    return feat_map, coords


def _reference(ply_bnc, w1, b1, w2t, b2, gamma, beta, eps=1e-5):
    f1 = ply_bnc @ w1 + b1                       # (B, N, Cout)
    f2 = f1.mean(axis=1)                         # (B, Cout)
    lin = f2 @ w2t + b2                          # (B, L)
    mu = lin.mean(axis=-1, keepdims=True)
    var = ((lin - mu) ** 2).mean(axis=-1, keepdims=True)
    ln = (lin - mu) * jax.lax.rsqrt(var + eps) * gamma + beta
    feat3 = jnp.broadcast_to(ln[:, None, :], (ply_bnc.shape[0],
                                              ply_bnc.shape[1], ln.shape[-1]))
    return jnp.concatenate([ply_bnc[:, :, :3], feat3], axis=-1)


if __name__ == "__main__":
    # small shapes consistent with the module
    B, N = 2, 16
    num_of_feat = 6
    width_multiplier = 2
    latent_size = 32
    Cout = num_of_feat * width_multiplier

    key = jax.random.PRNGKey(0)
    k_ply, k_w1, k_b1, k_w2, k_b2 = jax.random.split(key, 5)

    ply_bnc = jax.random.normal(k_ply, (B, N, num_of_feat), dtype=jnp.float32)

    # deterministic parameter init (synthetic, not a checkpoint)
    w1 = 0.1 * jax.random.normal(k_w1, (num_of_feat, Cout), dtype=jnp.float32)
    b1 = 0.1 * jax.random.normal(k_b1, (1, Cout), dtype=jnp.float32)
    w2t = 0.1 * jax.random.normal(k_w2, (Cout, latent_size), dtype=jnp.float32)
    b2 = 0.1 * jax.random.normal(k_b2, (1, latent_size), dtype=jnp.float32)
    gamma = jnp.ones((1, latent_size), dtype=jnp.float32)
    beta = jnp.zeros((1, latent_size), dtype=jnp.float32)

    feat_map, coords = feature_map_ae_forward(ply_bnc, w1, b1, w2t, b2,
                                              gamma, beta)
    jax.block_until_ready(feat_map)
    jax.block_until_ready(coords)

    ref = _reference(ply_bnc, w1, b1, w2t, b2, gamma[0], beta[0])
    assert feat_map.shape == (B, N, 3 + latent_size)
    assert coords.shape == (B, N, 3)
    assert jnp.allclose(feat_map, ref, rtol=1e-3, atol=1e-4)
    assert jnp.allclose(coords, ply_bnc[:, :, :3], rtol=1e-6, atol=1e-6)

    print("KERNEL_OK")
</pallas_src>

<mosaic_0001>
module attributes {stable_mosaic.version = 11 : i64} {
  func.func @reduce_kernel(%arg0: i32, %arg1: i32, %arg2: memref<1x16x6xf32, #tpu.memory_space<vmem>>, %arg3: memref<6x12xf32, #tpu.memory_space<vmem>>, %arg4: memref<1x12xf32, #tpu.memory_space<vmem>>, %arg5: memref<12x32xf32, #tpu.memory_space<vmem>>, %arg6: memref<1x32xf32, #tpu.memory_space<vmem>>, %arg7: memref<1x32xf32, #tpu.memory_space<vmem>>, %arg8: memref<1x32xf32, #tpu.memory_space<vmem>>, %arg9: memref<1x1x32xf32, #tpu.memory_space<vmem>>, %arg10: memref<1x6xf32, #tpu.memory_space<vmem>>) attributes {dimension_semantics = [#tpu.dimension_semantics<parallel>, #tpu.dimension_semantics<arbitrary>], iteration_bounds = array<i64: 2, 1>, scalar_prefetch = 0 : i64, scratch_operands = 1 : i64, tpu.core_type = #tpu.core_type<tc>, window_params = [{transform_indices = @transform_0, window_bounds = array<i64: 1, 16, 6>}, {pipeline_mode = #tpu.pipeline_mode<synchronous>, transform_indices = @transform_1, window_bounds = array<i64: 6, 12>}, {pipeline_mode = #tpu.pipeline_mode<synchronous>, transform_indices = @transform_2, window_bounds = array<i64: 1, 12>}, {pipeline_mode = #tpu.pipeline_mode<synchronous>, transform_indices = @transform_3, window_bounds = array<i64: 12, 32>}, {pipeline_mode = #tpu.pipeline_mode<synchronous>, transform_indices = @transform_4, window_bounds = array<i64: 1, 32>}, {pipeline_mode = #tpu.pipeline_mode<synchronous>, transform_indices = @transform_5, window_bounds = array<i64: 1, 32>}, {pipeline_mode = #tpu.pipeline_mode<synchronous>, transform_indices = @transform_6, window_bounds = array<i64: 1, 32>}, {transform_indices = @transform_7, window_bounds = array<i64: 1, 1, 32>}]} {
    %c0_i32 = arith.constant 0 : i32
    %0 = arith.cmpi eq, %arg1, %c0_i32 : i32
    %1 = arith.extui %0 : i1 to i32
    %c0_i32_0 = arith.constant 0 : i32
    %2 = arith.cmpi ne, %1, %c0_i32_0 : i32
    scf.if %2 {
      %cst_9 = arith.constant 0.000000e+00 : f32
      %13 = vector.broadcast %cst_9 : f32 to vector<1x6xf32>
      %c0_10 = arith.constant 0 : index
      %c0_11 = arith.constant 0 : index
      %14 = vector.load %arg10[%c0_10, %c0_11] : memref<1x6xf32, #tpu.memory_space<vmem>>, vector<1x6xf32>
      tpu.vector_store %arg10[%c0_10, %c0_11], %13 {strides = array<i32>} : memref<1x6xf32, #tpu.memory_space<vmem>>, vector<1x6xf32>,
    } else {
    }
    %c0 = arith.constant 0 : index
    %c0_1 = arith.constant 0 : index
    %3 = vector.load %arg10[%c0, %c0_1] : memref<1x6xf32, #tpu.memory_space<vmem>>, vector<1x6xf32>
    %c0_2 = arith.constant 0 : index
    %c0_3 = arith.constant 0 : index
    %c0_4 = arith.constant 0 : index
    %4 = vector.load %arg2[%c0_2, %c0_3, %c0_4] : memref<1x16x6xf32, #tpu.memory_space<vmem>>, vector<1x16x6xf32>
    %5 = vector.shape_cast %4 : vector<1x16x6xf32> to vector<16x6xf32>
    %cst = arith.constant dense<0.000000e+00> : vector<6xf32>
    %6 = vector.multi_reduction <add>, %5, %cst [0] : vector<16x6xf32> to vector<6xf32>
    %7 = vector.shape_cast %6 : vector<6xf32> to vector<1x6xf32>
    %8 = arith.addf %3, %7 : vector<1x6xf32>
    %c0_5 = arith.constant 0 : index
    %c0_6 = arith.constant 0 : index
    %9 = vector.load %arg10[%c0_5, %c0_6] : memref<1x6xf32, #tpu.memory_space<vmem>>, vector<1x6xf32>
    tpu.vector_store %arg10[%c0_5, %c0_6], %8 {strides = array<i32>} : memref<1x6xf32, #tpu.memory_space<vmem>>, vector<1x6xf32>,
    %c0_i32_7 = arith.constant 0 : i32
    %10 = arith.cmpi eq, %arg1, %c0_i32_7 : i32
    %11 = arith.extui %10 : i1 to i32
    %c0_i32_8 = arith.constant 0 : i32
    %12 = arith.cmpi ne, %11, %c0_i32_8 : i32
    scf.if %12 {
      %c0_9 = arith.constant 0 : index
      %c0_10 = arith.constant 0 : index
      %13 = vector.load %arg10[%c0_9, %c0_10] : memref<1x6xf32, #tpu.memory_space<vmem>>, vector<1x6xf32>
      %cst_11 = arith.constant 6.250000e-02 : f32
      %14 = vector.broadcast %cst_11 : f32 to vector<1x6xf32>
      %15 = arith.mulf %13, %14 : vector<1x6xf32>
      %c0_12 = arith.constant 0 : index
      %c0_13 = arith.constant 0 : index
      %16 = vector.load %arg3[%c0_12, %c0_13] : memref<6x12xf32, #tpu.memory_space<vmem>>, vector<6x12xf32>
      %cst_14 = arith.constant dense<0.000000e+00> : vector<1x12xf32>
      %17 = tpu.matmul %15, %16, %cst_14 {dimension_numbers = #tpu.dot_dimension_numbers<[1], [0], [0], [1], [0, 0, 1, 1], [], []>} : vector<1x6xf32>, vector<6x12xf32>, vector<1x12xf32> -> vector<1x12xf32>
      %c0_15 = arith.constant 0 : index
      %c0_16 = arith.constant 0 : index
      %18 = vector.load %arg4[%c0_15, %c0_16] : memref<1x12xf32, #tpu.memory_space<vmem>>, vector<1x12xf32>
      %19 = arith.addf %17, %18 : vector<1x12xf32>
      %c0_17 = arith.constant 0 : index
      %c0_18 = arith.constant 0 : index
      %20 = vector.load %arg5[%c0_17, %c0_18] : memref<12x32xf32, #tpu.memory_space<vmem>>, vector<12x32xf32>
      %cst_19 = arith.constant dense<0.000000e+00> : vector<1x32xf32>
      %21 = tpu.matmul %19, %20, %cst_19 {dimension_numbers = #tpu.dot_dimension_numbers<[1], [0], [0], [1], [0, 0, 1, 1], [], []>} : vector<1x12xf32>, vector<12x32xf32>, vector<1x32xf32> -> vector<1x32xf32>
      %c0_20 = arith.constant 0 : index
      %c0_21 = arith.constant 0 : index
      %22 = vector.load %arg6[%c0_20, %c0_21] : memref<1x32xf32, #tpu.memory_space<vmem>>, vector<1x32xf32>
      %23 = arith.addf %21, %22 : vector<1x32xf32>
      %cst_22 = arith.constant dense<0.000000e+00> : vector<1xf32>
      %24 = vector.multi_reduction <add>, %23, %cst_22 [1] : vector<1x32xf32> to vector<1xf32>
      %25 = vector.shape_cast %24 : vector<1xf32> to vector<1x1xf32>
      %cst_23 = arith.constant 3.200000e+01 : f32
      %26 = vector.broadcast %cst_23 : f32 to vector<1x1xf32>
      %27 = arith.divf %25, %26 : vector<1x1xf32>
      %28 = vector.broadcast %27 : vector<1x1xf32> to vector<1x32xf32>
      %29 = arith.subf %23, %28 : vector<1x32xf32>
      %30 = arith.mulf %29, %29 : vector<1x32xf32>
      %cst_24 = arith.constant dense<0.000000e+00> : vector<1xf32>
      %31 = vector.multi_reduction <add>, %30, %cst_24 [1] : vector<1x32xf32> to vector<1xf32>
      %32 = vector.shape_cast %31 : vector<1xf32> to vector<1x1xf32>
      %cst_25 = arith.constant 3.200000e+01 : f32
      %33 = vector.broadcast %cst_25 : f32 to vector<1x1xf32>
      %34 = arith.divf %32, %33 : vector<1x1xf32>
      %35 = vector.broadcast %27 : vector<1x1xf32> to vector<1x32xf32>
      %36 = arith.subf %23, %35 : vector<1x32xf32>
      %cst_26 = arith.constant 9.99999974E-6 : f32
      %37 = vector.broadcast %cst_26 : f32 to vector<1x1xf32>
      %38 = arith.addf %34, %37 : vector<1x1xf32>
      %39 = math.rsqrt %38 : vector<1x1xf32>
      %40 = vector.broadcast %39 : vector<1x1xf32> to vector<1x32xf32>
      %41 = arith.mulf %36, %40 : vector<1x32xf32>
      %c0_27 = arith.constant 0 : index
      %c0_28 = arith.constant 0 : index
      %42 = vector.load %arg7[%c0_27, %c0_28] : memref<1x32xf32, #tpu.memory_space<vmem>>, vector<1x32xf32>
      %43 = arith.mulf %41, %42 : vector<1x32xf32>
      %c0_29 = arith.constant 0 : index
      %c0_30 = arith.constant 0 : index
      %44 = vector.load %arg8[%c0_29, %c0_30] : memref<1x32xf32, #tpu.memory_space<vmem>>, vector<1x32xf32>
      %45 = arith.addf %43, %44 : vector<1x32xf32>
      %c0_31 = arith.constant 0 : index
      %c0_32 = arith.constant 0 : index
      %c0_33 = arith.constant 0 : index
      %46 = vector.load %arg9[%c0_31, %c0_32, %c0_33] : memref<1x1x32xf32, #tpu.memory_space<vmem>>, vector<1x1x32xf32>
      %47 = vector.shape_cast %46 : vector<1x1x32xf32> to vector<1x32xf32>
      %48 = vector.shape_cast %45 : vector<1x32xf32> to vector<1x1x32xf32>
      tpu.vector_store %arg9[%c0_31, %c0_32, %c0_33], %48 {strides = array<i32>} : memref<1x1x32xf32, #tpu.memory_space<vmem>>, vector<1x1x32xf32>,
    } else {
    }
    return
  }
  func.func @transform_0(%arg0: i32, %arg1: i32) -> (i32, i32, i32) {
    %c0_i32 = arith.constant 0 : i32
    %c0_i32_0 = arith.constant 0 : i32
    return %arg0, %arg1, %c0_i32 : i32, i32, i32
  }
  func.func @transform_1(%arg0: i32, %arg1: i32) -> (i32, i32) {
    %c0_i32 = arith.constant 0 : i32
    %c0_i32_0 = arith.constant 0 : i32
    %c0_i32_1 = arith.constant 0 : i32
    return %c0_i32, %c0_i32_0 : i32, i32
  }
  func.func @transform_2(%arg0: i32, %arg1: i32) -> (i32, i32) {
    %c0_i32 = arith.constant 0 : i32
    %c0_i32_0 = arith.constant 0 : i32
    %c0_i32_1 = arith.constant 0 : i32
    return %c0_i32, %c0_i32_0 : i32, i32
  }
  func.func @transform_3(%arg0: i32, %arg1: i32) -> (i32, i32) {
    %c0_i32 = arith.constant 0 : i32
    %c0_i32_0 = arith.constant 0 : i32
    %c0_i32_1 = arith.constant 0 : i32
    return %c0_i32, %c0_i32_0 : i32, i32
  }
  func.func @transform_4(%arg0: i32, %arg1: i32) -> (i32, i32) {
    %c0_i32 = arith.constant 0 : i32
    %c0_i32_0 = arith.constant 0 : i32
    %c0_i32_1 = arith.constant 0 : i32
    return %c0_i32, %c0_i32_0 : i32, i32
  }
  func.func @transform_5(%arg0: i32, %arg1: i32) -> (i32, i32) {
    %c0_i32 = arith.constant 0 : i32
    %c0_i32_0 = arith.constant 0 : i32
    %c0_i32_1 = arith.constant 0 : i32
    return %c0_i32, %c0_i32_0 : i32, i32
  }
  func.func @transform_6(%arg0: i32, %arg1: i32) -> (i32, i32) {
    %c0_i32 = arith.constant 0 : i32
    %c0_i32_0 = arith.constant 0 : i32
    %c0_i32_1 = arith.constant 0 : i32
    return %c0_i32, %c0_i32_0 : i32, i32
  }
  func.func @transform_7(%arg0: i32, %arg1: i32) -> (i32, i32, i32) {
    %c0_i32 = arith.constant 0 : i32
    %c0_i32_0 = arith.constant 0 : i32
    %c0_i32_1 = arith.constant 0 : i32
    return %arg0, %c0_i32, %c0_i32_0 : i32, i32, i32
  }
}

</mosaic_0001>

<bundles_post_ra>
// kernel: tpu_custom_call.1
= control target key start
LH: loop header
LB: loop body
LE: loop exit
PB: predicated region body
PF: predicated region fallthrough
CT: control target
= control target key end

     0   :  { %12 = vsyncpa [#allocation4], 0  ;;  %s831_s0 = inlined_call_operand.vmem [shape: f32[2,16,6], index: 0, kind: input, shape index: {}]   ;;  %s832_s1 = inlined_call_operand.vmem [shape: f32[6,12], index: 1, kind: input, shape index: {}]   ;;  %s833_s2 = inlined_call_operand.vmem [shape: f32[1,12], index: 2, kind: input, shape index: {}]   ;;  %s834_s3 = inlined_call_operand.vmem [shape: f32[12,32], index: 3, kind: input, shape index: {}]   ;;  %s835_s4 = inlined_call_operand.vmem [shape: f32[1,32], index: 4, kind: input, shape index: {}]   ;;  %s836_s5 = inlined_call_operand.vmem [shape: f32[1,32], index: 5, kind: input, shape index: {}]   ;;  %s837_s6 = inlined_call_operand.vmem [shape: f32[1,32], index: 6, kind: input, shape index: {}]   ;;  %s838_s7 = inlined_call_operand.hbm [shape: f32[2,1,32], index: 7, kind: output, shape index: {}]  }
   0x1   :  { %14 = vsyncpa [#allocation4 + $0x1], 0  ;;  %s705_s24 = smov 0   ;;  %s707_s25 = smov 0  }
   0x2   :  { %s709_s26 = smov 0   ;;  %s711_s27 = smov 0  }
   0x3   :  { %s713_s28 = smov 0   ;;  %s715_s29 = smov 0  }
   0x4 LB: > { %s508_s30 = sadd.s32 4294967295, %s661_s29   ;;  %s509_s8 = sadd.s32 4294967294, %s661_s29   ;;  %s661_s29 = sphi %s715_s29, %s20_s29   ;;  %s657_s28 = sphi %s713_s28, %s845_s28   ;;  %s653_s27 = sphi %s711_s27, %s844_s27   ;;  %s649_s26 = sphi %s709_s26, %s843_s26   ;;  %s645_s25 = sphi %s707_s25, %s842_s25   ;;  %s641_s24 = sphi %s705_s24, %s841_s24  }
   0x5   : > { %s32_s9 = sadd.s32 1, %s657_s28  ;;  %s193_s10 = sadd.s32 1, %s649_s26 }
   0x6   : > { %p34_p0 = scmp.ge.s32.totalorder %s32_s9, 2  ;;  %p203_p1 = scmp.ne.s32.totalorder %s649_s26, %s645_s25 }
   0x7   : > { %p204_p2 = scmp.eq.s32.totalorder %s508_s30, 1  ;;  %p209_p3 = scmp.ne.s32.totalorder %s645_s25, %s641_s24 }
   0x8   : > { %s847_s9 = smov (%p34_p0, %s32_s9), 0  ;;  %p210_p5 = scmp.eq.s32.totalorder %s509_s8, 1 }
   0x9   : > { %p745_p4 = por %p204_p2, %p203_p1  ;;  %s190_s12 = ssub.s32 %s657_s28, %s847_s9 }
   0xa   : > { %p512_p6 = scmp.ge.s32.totalorder %s661_s29, 1  ;;  %p191_p7 = scmp.eq.s32.totalorder %s190_s12, 0 }
   0xb   : > { %p752_p8 = por %p210_p5, %p209_p3  ;;  %p259_p9 = scmp.lt.s32.totalorder %s661_s29, 3 }
   0xc   : > { %s758_s14 = scalar_select %p191_p7, %s649_s26, %s193_s10  }
   0xd   : > { %p260_p10 = pnand %p512_p6, %p259_p9 }
   0xe   : > { %p295_p11 = scmp.lt.s32.totalorder (!%p260_p10), %s653_s27, 1  ;;  %s435_s20 = scalar_lea.hbm (!%p260_p10), %s838_s7, %s653_s27 }
   0xf   : > { %263 = sbr.rel (%p260_p10) target bundleno = 579 (0x243), region = 48  ;;  %s439_s12 = sshll.u32 (!%p260_p10), %s435_s20, 4  ;;  %s440_s12 = int_to_ptr.hbm [resolvable:$true] %s439_s12 }
  0x10   : > { %s597_s15 = sshra.s32 (!%p260_p10), %s440_s12, 4  ;;  %s598_s15 = int_to_ptr.hbm [resolvable:$true] %s597_s15 }
  0x11   : > { %s599_s16 = scalar_lea.hbm (!%p260_p10), %s598_s15, 1  ;;  %p604_p1 = scmp.lt.s32.totalorder (!%p260_p10), %s598_s15, %s838_s7 }
  0x12   : > { %p600_p12 = scmp.ne.s32.totalorder (!%p260_p10), %s598_s15, %s599_s16 }
  0x14   : > { %v331_v0 = vld [vmem:[%s832_s1] sm:$0x3f]  ;;  %vm336_vm0 = vcmask 1045504   ;;  %vm308_vm1 = vcmask 40960   ;;  %v663_v1 = vmov 0.0   ;;  %s296_s17 = scalar_select %p295_p11, %s653_s27, 1 }
  0x15   : > { %515 = vmatpush.msk.msra.mxu0 %vm336_vm0, %v331_v0  ;;  %309 = vst.msk [vmem:[#allocation2] sm:$0x1] %vm308_vm1, %v663_v1  ;;  %vm313_vm2 = vcmask 48128   ;;  %v361_v17 = vld [vmem:[%s834_s3 + $0x8] sm:$0xf]  ;;  %vm367_vm3 = vcmask 1043456   ;;  %p601_p13 = pnand %p600_p12, %p745_p4 }
  0x16   : > { %s521_s18 = sshll.u32 %s296_s17, 4  ;;  %517 = vmatpush.msk.msra.mxu1 %vm367_vm3, %v361_v17  ;;  %v360_v18 = vld [vmem:[%s834_s3] sm:$0xff]  ;;  %vm363_vm4 = vcmask 97280   ;;  %vm391_vm5 = vcmask 253952   ;;  %v664_v26 = vmov 32.0   ;;  %s292_s17 = sand.u32 1, %s645_s25  }
  0x17   : > { %s302_s21 = scalar_lea.vmem %s831_s0, %s521_s18  ;;  %v332_v19 = vld [vmem:[%s833_s2] sm:$0x1]  ;;  %579 = vrcp.f32 %v664_v26  ;;  %s293_s8 = scalar_lea.vmem [#allocation3], %s292_s17 }
  0x18   : > { %v311_v2 = vld [vmem:[%s302_s21] sm:$0xff]  ;;  %v312_v3 = vld [vmem:[%s302_s21 + $0x8] sm:$0xff]  ;;  %386 = vmatpush.msra.mxu1 %v360_v18  ;;  %s437_s10 = sshll.u32 %s293_s8, 4  ;;  %s427_s27 = scalar_lea.sflag [#allocation4], %s292_s17  ;;  %s438_s10 = int_to_ptr.vmem [resolvable:$true] %s437_s10 }
  0x19   : > { %v314_v4 = vsel %vm313_vm2, %v311_v2, 0.0  ;;  %v315_v5 = vsel %vm313_vm2, %v312_v3, 0.0  ;;  %v362_v22 = vld [vmem:[%s835_s4] sm:$0x1]  ;;  %p602_p0 = pneg %p601_p13  ;;  %s603_s21 = scalar_lea.hbm %s838_s7, 2 }
  0x1a   : > { %v316_v6 = vadd.f32 %v315_v5, %v314_v4  ;;  %v421_v48 = vld [vmem:[%s836_s5] sm:$0x1]  ;;  %p605_p2 = scmp.lt.s32.totalorder %s603_s21, %s599_s16 }
  0x1b   : > { %v423_v50 = vld [vmem:[%s837_s6] sm:$0x1] }
  0x1c   : > { %v317_v7 = vrot.slane %v316_v6, 4  ;;  %v310_v12 = vld [vmem:[#allocation2] sm:$0x1]  ;;  %p606_p3 = por %p605_p2, %p604_p1 }
  0x1d   : > { %v580_v27 = vpop.eup %579 }
  0x1e   : > { %v318_v8 = vadd.f32 %v317_v7, %v316_v6  ;;  %v396_v28 = vmul.f32 32.0, %v580_v27  ;;  %vm400_vm6 = vweird.f32 %v580_v27  ;;  %p607_p5 = pnand %p606_p3, %p602_p0 }
  0x20   : > { %v319_v9 = vrot.slane %v318_v8, 2  ;;  %v397_v29 = vsub.f32 1.0, %v396_v28 }
  0x22   : > { %v320_v10 = vadd.f32 %v319_v9, %v318_v8  ;;  %v398_v30 = vmul.f32 %v580_v27, %v397_v29 }
  0x24   : > { %v321_v11 = vrot.slane %v320_v10, 1  ;;  %v399_v31 = vadd.f32 %v580_v27, %v398_v30 }
  0x26   : > { %v322_v13 = vadd.f32 %v321_v11, %v320_v10  ;;  %v401_v32 = vsel %vm400_vm6, %v580_v27, %v399_v31 }
  0x28   : > { %v323_v14 = vadd.f32 %v322_v13, %v310_v12 }
  0x2a   : > { %325 = vst.msk [vmem:[#allocation2] sm:$0x1] %vm308_vm1, %v323_v14 }
  0x31   : > { %v329_v15 = vld [vmem:[#allocation2] sm:$0x1] }
  0x32   : > { %v330_v16 = vmul.f32 0.0625, %v329_v15 }
  0x34   : > { %516 = vmatmul.msk.f32.vlgmr.msra.gmra.mxu0 %vm313_vm2, %v330_v16 }
  0xb1   : > { %v357_v20 = vpop.f32.mrf.mxu0 }
  0xb2   : > { %v358_v21 = vadd.f32 %v357_v20, %v332_v19 }
  0xb4   : > { %518 = vmatmul.msk.f32.vlgmr.msra.gmra.mxu1 %vm363_vm4, %v358_v21 }
 0x131   : > { %v388_v23 = vpop.f32.mrf.mxu1 }
 0x132   : > { %v389_v24 = vadd.f32 %v388_v23, %v362_v22 }
 0x134   : > { %v392_v25 = vsel %vm391_vm5, %v389_v24, 0.0 }
 0x135   : > { %393 = vadd.xlane.f32.xlu0 %v392_v25 }
 0x1a8   : > { %v394_v33 = vpop.xlane.xlu0 %393 }
 0x1a9   : > { %v402_v34 = vmul.f32 %v401_v32, %v394_v33 }
 0x1ab   : > { %v403_v35 = vsub.f32 %v389_v24, %v402_v34 }
 0x1ad   : > { %v404_v36 = vmul.f32 %v403_v35, %v403_v35 }
 0x1af   : > { %v405_v37 = vsel %vm391_vm5, %v404_v36, 0.0 }
 0x1b0   : > { %406 = vadd.xlane.f32.xlu0 %v405_v37 }
 0x223   : > { %v407_v38 = vpop.xlane.xlu0 %406 }
 0x224   : > { %v408_v39 = vmul.f32 %v407_v38, %v401_v32 }
 0x226   : > { %v409_v40 = vadd.f32 1e-05, %v408_v39 }
 0x228   : > { %581 = vrsqrt.f32 %v409_v40  ;;  %vm416_vm8 = vweird.f32 %v409_v40 }
 0x22e   : > { %v582_v41 = vpop.eup %581 }
 0x22f   : > { %v411_v42 = vmul.f32 %v582_v41, %v409_v40  ;;  %vm417_vm7 = vweird.f32 %v582_v41 }
 0x230   : > { %vm418_vm9 = vmor %vm416_vm8, %vm417_vm7 }
 0x231   : > { %v412_v43 = vmul.f32 %v582_v41, %v411_v42 }
 0x233   : > { %v413_v44 = vmul.f32 0.5, %v412_v43 }
 0x235   : > { %v414_v45 = vsub.f32 1.5, %v413_v44 }
 0x237   : > { %v415_v46 = vmul.f32 %v582_v41, %v414_v45 }
 0x239   : > { %v419_v47 = vsel %vm418_vm9, %v582_v41, %v415_v46 }
 0x23a   : > { %v420_v49 = vmul.f32 %v419_v47, %v403_v35 }
 0x23c   : > { %v422_v51 = vmul.f32 %v421_v48, %v420_v49 }
 0x23e   : > { %v424_v52 = vadd.f32 %v423_v50, %v422_v51 }
 0x240   : > { %425 = vst.msk [vmem:[%s293_s8] sm:$0x1] %vm391_vm5, %v424_v52 }
 0x241   : > { %610 = shalt.err (!%p607_p5)
}
 0x242   : > { %522 = dma.vmem_to_hbm [thread:$0]  (%p745_p4), %s438_s10, 16, %s440_s12, %s427_s27  }
 0x243 PF: > { %p528_p6 = scmp.ge.s32.totalorder %s661_s29, 2  ;;  %s451_s17 = sand.u32 1, %s641_s24  }
 0x244   : > { %s452_s23 = scalar_lea.sflag [#allocation4], %s451_s17 }
 0x245   : > { %p525_p7 = pnand %p528_p6, %p752_p8 }
 0x247   : > { %p526_p9 = pneg %p525_p7 }
 0x249   : > { %636 = dma.done.wait (%p526_p9), %s452_s23, 16  }
 0x24a   : > { %638 = vsyncadd (%p526_p9), %s452_s23, 4294967280  ;;  %s20_s29 = sadd.s32 1, %s661_s29   ;;  %s841_s24 = smov %s645_s25 }
 0x24b   : > { %p17_p10 = scmp.ge.s32.totalorder %s20_s29, 4   ;;  %s842_s25 = smov %s649_s26 }
 0x24c   : > { %s843_s26 = smov %s758_s14  ;;  %s844_s27 = smov %s657_s28 }
 0x24d   : > { %s845_s28 = smov %s847_s9  ;;  %19 = sbr.rel (!%p17_p10) target bundleno = 4 (0x4), region = 91 }
 0x252   :  { %457 = vsyncpa [#allocation4], 1 }
 0x253   :  { %459 = vsyncpa [#allocation4 + $0x1], 1 }

</bundles_post_ra>
